<compile_context>
chip_gen: v6e
topology: v6e:2x2x1
jax: 0.10.0
libtpu: 0.0.40
codegen_flags: <defaults>
</compile_context>

<pallas_src>
import jax
import jax.numpy as jnp
from jax.experimental import pallas as pl
from jax.experimental.pallas import tpu as pltpu

INPUT_SIZE = 11
HIDDEN1 = 128
HIDDEN2 = 64
NUM_CLASSES = 4
EPS = 1e-5


def _mlp_kernel(x_ref, w1_ref, b1_ref, w2_ref, b2_ref, w3_ref, b3_ref, o_ref):
    """One batch tile: fc1+relu -> fc2+relu -> fc3.

    Matmul inputs are cast to the weight dtype (bf16 fast path or f32);
    accumulation and bias adds are always float32.
    """
    cd = w1_ref.dtype  # compute dtype for the MXU inputs

    x = x_ref[...].astype(cd)

    h1 = jnp.dot(x, w1_ref[...], preferred_element_type=jnp.float32) + b1_ref[...]
    h1 = jnp.maximum(h1, 0.0)

    h2 = (jnp.dot(h1.astype(cd), w2_ref[...], preferred_element_type=jnp.float32)
          + b2_ref[...])
    h2 = jnp.maximum(h2, 0.0)

    out = (jnp.dot(h2.astype(cd), w3_ref[...], preferred_element_type=jnp.float32)
           + b3_ref[...])
    o_ref[...] = out.astype(o_ref.dtype)


def depression_model_forward(x, params, *, compute_dtype=jnp.bfloat16, batch_tile=256):
    """x: (B, INPUT_SIZE) float32. params: dict from init_params()."""
    B = x.shape[0]

    # ---- fold NormFunction1D into fc1 (exact affine-into-affine fold) -------------
    inv_std = params["gamma"] * jax.lax.rsqrt(params["v"] + EPS)        # (1, 11)
    w1_eff = params["w1"] * jnp.reshape(inv_std, (INPUT_SIZE, 1))       # (11, 128)
    b1_eff = params["b1"] + (params["beta"] - params["m"] * inv_std) @ params["w1"]

    # ---- weight dtype for the MXU (biases stay f32; accumulation is f32) ----------
    w1 = w1_eff.astype(compute_dtype)
    w2 = params["w2"].astype(compute_dtype)
    w3 = params["w3"].astype(compute_dtype)
    b1 = b1_eff.astype(jnp.float32)
    b2 = params["b2"].astype(jnp.float32)
    b3 = params["b3"].astype(jnp.float32)

    # ---- batch tiling --------------------------------------------------------------
    if B <= batch_tile:
        bt = B                               # single tile; block == full batch dim
    else:
        bt = max(8, (batch_tile // 8) * 8)   # keep sublane-aligned tile
    grid_b = pl.cdiv(B, bt)

    # Explicit per-argument specs (no shared late-binding lambda). Weights/biases use
    # a constant block index so Pallas keeps them resident in VMEM across the grid.
    in_specs = [
        pl.BlockSpec((bt, INPUT_SIZE), lambda i: (i, 0)),         # x tile
        pl.BlockSpec((INPUT_SIZE, HIDDEN1), lambda i: (0, 0)),    # w1 (norm folded)
        pl.BlockSpec((1, HIDDEN1), lambda i: (0, 0)),             # b1
        pl.BlockSpec((HIDDEN1, HIDDEN2), lambda i: (0, 0)),       # w2
        pl.BlockSpec((1, HIDDEN2), lambda i: (0, 0)),             # b2
        pl.BlockSpec((HIDDEN2, NUM_CLASSES), lambda i: (0, 0)),   # w3
        pl.BlockSpec((1, NUM_CLASSES), lambda i: (0, 0)),         # b3
    ]
    out_specs = pl.BlockSpec((bt, NUM_CLASSES), lambda i: (i, 0))

    # Advisory hints: scoped VMEM (tiles + resident weights are tiny) and cost.
    flops = 2 * B * (INPUT_SIZE * HIDDEN1 + HIDDEN1 * HIDDEN2 + HIDDEN2 * NUM_CLASSES)
    weight_bytes = (w1.size + w2.size + w3.size) * jnp.dtype(compute_dtype).itemsize \
        + (b1.size + b2.size + b3.size) * 4
    bytes_accessed = B * (INPUT_SIZE + NUM_CLASSES) * 4 + weight_bytes

    return pl.pallas_call(
        _mlp_kernel,
        grid=(grid_b,),
        in_specs=in_specs,
        out_specs=out_specs,
        out_shape=jax.ShapeDtypeStruct((B, NUM_CLASSES), jnp.float32),
        compiler_params=pltpu.CompilerParams(
            dimension_semantics=("parallel",),        # shard batch tiles across TCs
            vmem_limit_bytes=32 * 1024 * 1024,
        ),
        cost_estimate=pl.CostEstimate(
            flops=flops, transcendentals=0, bytes_accessed=bytes_accessed),
    )(x, w1, b1, w2, b2, w3, b3)


def init_params(key):
    """Deterministic synthetic parameters with the shapes from __init__.

    Linear weights are created as (out, in) like PyTorch, then transposed to
    (in, out) for the x @ W layout used in the kernel. Biases are (1, out).
    """
    ks = jax.random.split(key, 6)

    def uniform(k, shape, fan_in):
        bound = 1.0 / jnp.sqrt(jnp.float32(fan_in))
        return jax.random.uniform(k, shape, jnp.float32, -bound, bound)

    w1_t = uniform(ks[0], (HIDDEN1, INPUT_SIZE), INPUT_SIZE)   # (out, in)
    b1 = uniform(ks[1], (1, HIDDEN1), INPUT_SIZE)
    w2_t = uniform(ks[2], (HIDDEN2, HIDDEN1), HIDDEN1)
    b2 = uniform(ks[3], (1, HIDDEN2), HIDDEN1)
    w3_t = uniform(ks[4], (NUM_CLASSES, HIDDEN2), HIDDEN2)
    b3 = uniform(ks[5], (1, NUM_CLASSES), HIDDEN2)

    return {
        # NormFunction1D params (initialized exactly as in the module)
        "gamma": jnp.ones((1, INPUT_SIZE), jnp.float32),
        "beta": jnp.zeros((1, INPUT_SIZE), jnp.float32),
        "m": jnp.ones((1, INPUT_SIZE), jnp.float32),
        "v": jnp.ones((1, INPUT_SIZE), jnp.float32),
        # Linear layers stored as (in, out)
        "w1": w1_t.T, "b1": b1,
        "w2": w2_t.T, "b2": b2,
        "w3": w3_t.T, "b3": b3,
    }


def _reference_forward(x, p):
    """Pure-JAX f32 reference with the original (un-folded) module semantics."""
    xn = (x - p["m"]) / jnp.sqrt(p["v"] + EPS) * p["gamma"] + p["beta"]
    h1 = jnp.maximum(xn @ p["w1"] + p["b1"], 0.0)
    h2 = jnp.maximum(h1 @ p["w2"] + p["b2"], 0.0)
    return h2 @ p["w3"] + p["b3"]


if __name__ == "__main__":
    key = jax.random.PRNGKey(0)
    k_x, k_p = jax.random.split(key)

    B = 8
    x = jax.random.normal(k_x, (B, INPUT_SIZE), jnp.float32)
    params = init_params(k_p)

    ref = _reference_forward(x, params)

    # 1) Exact-semantics path (f32 MXU inputs): must match the reference tightly.
    out_f32 = jax.block_until_ready(
        depression_model_forward(x, params, compute_dtype=jnp.float32))
    assert out_f32.shape == (B, NUM_CLASSES)
    assert jnp.allclose(out_f32, ref, atol=1e-4, rtol=1e-4), (
        f"f32 path max abs diff {jnp.max(jnp.abs(out_f32 - ref))}")

    # 2) Fast bf16-MXU path (f32 accumulation): looser tolerance for bf16 rounding.
    out_bf16 = jax.block_until_ready(
        depression_model_forward(x, params, compute_dtype=jnp.bfloat16))
    assert out_bf16.shape == (B, NUM_CLASSES)
    assert jnp.allclose(out_bf16, ref, atol=5e-2, rtol=5e-2), (
        f"bf16 path max abs diff {jnp.max(jnp.abs(out_bf16 - ref))}")

    print("KERNEL_OK")
</pallas_src>

<mosaic_0001>
module attributes {stable_mosaic.version = 11 : i64} {
  func.func @_mlp_kernel(%arg0: i32, %arg1: memref<8x11xf32, #tpu.memory_space<vmem>>, %arg2: memref<11x128xf32, #tpu.memory_space<vmem>>, %arg3: memref<1x128xf32, #tpu.memory_space<vmem>>, %arg4: memref<128x64xf32, #tpu.memory_space<vmem>>, %arg5: memref<1x64xf32, #tpu.memory_space<vmem>>, %arg6: memref<64x4xf32, #tpu.memory_space<vmem>>, %arg7: memref<1x4xf32, #tpu.memory_space<vmem>>, %arg8: memref<8x4xf32, #tpu.memory_space<vmem>>) attributes {dimension_semantics = [#tpu.dimension_semantics<parallel>], iteration_bounds = array<i64: 1>, scalar_prefetch = 0 : i64, scratch_operands = 0 : i64, tpu.core_type = #tpu.core_type<tc>, window_params = [{transform_indices = @transform_0, window_bounds = array<i64: 8, 11>}, {pipeline_mode = #tpu.pipeline_mode<synchronous>, transform_indices = @transform_1, window_bounds = array<i64: 11, 128>}, {pipeline_mode = #tpu.pipeline_mode<synchronous>, transform_indices = @transform_2, window_bounds = array<i64: 1, 128>}, {pipeline_mode = #tpu.pipeline_mode<synchronous>, transform_indices = @transform_3, window_bounds = array<i64: 128, 64>}, {pipeline_mode = #tpu.pipeline_mode<synchronous>, transform_indices = @transform_4, window_bounds = array<i64: 1, 64>}, {pipeline_mode = #tpu.pipeline_mode<synchronous>, transform_indices = @transform_5, window_bounds = array<i64: 64, 4>}, {pipeline_mode = #tpu.pipeline_mode<synchronous>, transform_indices = @transform_6, window_bounds = array<i64: 1, 4>}, {transform_indices = @transform_7, window_bounds = array<i64: 8, 4>}]} {
    %c0 = arith.constant 0 : index
    %c0_0 = arith.constant 0 : index
    %0 = vector.load %arg1[%c0, %c0_0] : memref<8x11xf32, #tpu.memory_space<vmem>>, vector<8x11xf32>
    %c0_1 = arith.constant 0 : index
    %c0_2 = arith.constant 0 : index
    %1 = vector.load %arg2[%c0_1, %c0_2] : memref<11x128xf32, #tpu.memory_space<vmem>>, vector<11x128xf32>
    %cst = arith.constant dense<0.000000e+00> : vector<8x128xf32>
    %2 = tpu.matmul %0, %1, %cst {dimension_numbers = #tpu.dot_dimension_numbers<[1], [0], [0], [1], [0, 0, 1, 1], [], []>} : vector<8x11xf32>, vector<11x128xf32>, vector<8x128xf32> -> vector<8x128xf32>
    %c0_3 = arith.constant 0 : index
    %c0_4 = arith.constant 0 : index
    %3 = vector.load %arg3[%c0_3, %c0_4] : memref<1x128xf32, #tpu.memory_space<vmem>>, vector<1x128xf32>
    %4 = vector.broadcast %3 : vector<1x128xf32> to vector<8x128xf32>
    %5 = arith.addf %2, %4 : vector<8x128xf32>
    %cst_5 = arith.constant 0.000000e+00 : f32
    %6 = vector.broadcast %cst_5 : f32 to vector<8x128xf32>
    %7 = arith.maximumf %5, %6 : vector<8x128xf32>
    %c0_6 = arith.constant 0 : index
    %c0_7 = arith.constant 0 : index
    %8 = vector.load %arg4[%c0_6, %c0_7] : memref<128x64xf32, #tpu.memory_space<vmem>>, vector<128x64xf32>
    %cst_8 = arith.constant dense<0.000000e+00> : vector<8x64xf32>
    %9 = tpu.matmul %7, %8, %cst_8 {dimension_numbers = #tpu.dot_dimension_numbers<[1], [0], [0], [1], [0, 0, 1, 1], [], []>} : vector<8x128xf32>, vector<128x64xf32>, vector<8x64xf32> -> vector<8x64xf32>
    %c0_9 = arith.constant 0 : index
    %c0_10 = arith.constant 0 : index
    %10 = vector.load %arg5[%c0_9, %c0_10] : memref<1x64xf32, #tpu.memory_space<vmem>>, vector<1x64xf32>
    %11 = vector.broadcast %10 : vector<1x64xf32> to vector<8x64xf32>
    %12 = arith.addf %9, %11 : vector<8x64xf32>
    %cst_11 = arith.constant 0.000000e+00 : f32
    %13 = vector.broadcast %cst_11 : f32 to vector<8x64xf32>
    %14 = arith.maximumf %12, %13 : vector<8x64xf32>
    %c0_12 = arith.constant 0 : index
    %c0_13 = arith.constant 0 : index
    %15 = vector.load %arg6[%c0_12, %c0_13] : memref<64x4xf32, #tpu.memory_space<vmem>>, vector<64x4xf32>
    %cst_14 = arith.constant dense<0.000000e+00> : vector<8x4xf32>
    %16 = tpu.matmul %14, %15, %cst_14 {dimension_numbers = #tpu.dot_dimension_numbers<[1], [0], [0], [1], [0, 0, 1, 1], [], []>} : vector<8x64xf32>, vector<64x4xf32>, vector<8x4xf32> -> vector<8x4xf32>
    %c0_15 = arith.constant 0 : index
    %c0_16 = arith.constant 0 : index
    %17 = vector.load %arg7[%c0_15, %c0_16] : memref<1x4xf32, #tpu.memory_space<vmem>>, vector<1x4xf32>
    %18 = vector.broadcast %17 : vector<1x4xf32> to vector<8x4xf32>
    %19 = arith.addf %16, %18 : vector<8x4xf32>
    %c0_17 = arith.constant 0 : index
    %c0_18 = arith.constant 0 : index
    %20 = vector.load %arg8[%c0_17, %c0_18] : memref<8x4xf32, #tpu.memory_space<vmem>>, vector<8x4xf32>
    tpu.vector_store %arg8[%c0_17, %c0_18], %19 {strides = array<i32>} : memref<8x4xf32, #tpu.memory_space<vmem>>, vector<8x4xf32>,
    return
  }
  func.func @transform_0(%arg0: i32) -> (i32, i32) {
    %c0_i32 = arith.constant 0 : i32
    %c0_i32_0 = arith.constant 0 : i32
    return %arg0, %c0_i32 : i32, i32
  }
  func.func @transform_1(%arg0: i32) -> (i32, i32) {
    %c0_i32 = arith.constant 0 : i32
    %c0_i32_0 = arith.constant 0 : i32
    %c0_i32_1 = arith.constant 0 : i32
    return %c0_i32, %c0_i32_0 : i32, i32
  }
  func.func @transform_2(%arg0: i32) -> (i32, i32) {
    %c0_i32 = arith.constant 0 : i32
    %c0_i32_0 = arith.constant 0 : i32
    %c0_i32_1 = arith.constant 0 : i32
    return %c0_i32, %c0_i32_0 : i32, i32
  }
  func.func @transform_3(%arg0: i32) -> (i32, i32) {
    %c0_i32 = arith.constant 0 : i32
    %c0_i32_0 = arith.constant 0 : i32
    %c0_i32_1 = arith.constant 0 : i32
    return %c0_i32, %c0_i32_0 : i32, i32
  }
  func.func @transform_4(%arg0: i32) -> (i32, i32) {
    %c0_i32 = arith.constant 0 : i32
    %c0_i32_0 = arith.constant 0 : i32
    %c0_i32_1 = arith.constant 0 : i32
    return %c0_i32, %c0_i32_0 : i32, i32
  }
  func.func @transform_5(%arg0: i32) -> (i32, i32) {
    %c0_i32 = arith.constant 0 : i32
    %c0_i32_0 = arith.constant 0 : i32
    %c0_i32_1 = arith.constant 0 : i32
    return %c0_i32, %c0_i32_0 : i32, i32
  }
  func.func @transform_6(%arg0: i32) -> (i32, i32) {
    %c0_i32 = arith.constant 0 : i32
    %c0_i32_0 = arith.constant 0 : i32
    %c0_i32_1 = arith.constant 0 : i32
    return %c0_i32, %c0_i32_0 : i32, i32
  }
  func.func @transform_7(%arg0: i32) -> (i32, i32) {
    %c0_i32 = arith.constant 0 : i32
    %c0_i32_0 = arith.constant 0 : i32
    return %arg0, %c0_i32 : i32, i32
  }
}

</mosaic_0001>

<bundles_post_ra>
// kernel: tpu_custom_call.1
= control target key start
LH: loop header
LB: loop body
LE: loop exit
PB: predicated region body
PF: predicated region fallthrough
CT: control target
= control target key end

     0   :  { %vm40_vm0 = vcmask 1042432   ;;  %v402_v0 = vmov 0.0   ;;  %vm403_vm1 = vmmov 0   ;;  %vm36_vm2 = vcmask 89088   ;;  %s569_s1 = inlined_call_operand.vmem [shape: f32[11,128], index: 1, kind: input, shape index: {}]   ;;  %s570_s0 = inlined_call_operand.vmem [shape: f32[8,11], index: 0, kind: input, shape index: {}]   ;;  %s571_s3 = inlined_call_operand.vmem [shape: f32[128,64], index: 3, kind: input, shape index: {}]   ;;  %s572_s5 = inlined_call_operand.vmem [shape: f32[64,4], index: 5, kind: input, shape index: {}]   ;;  %s573_s2 = inlined_call_operand.vmem [shape: f32[1,128], index: 2, kind: input, shape index: {}]   ;;  %s574_s4 = inlined_call_operand.vmem [shape: f32[1,64], index: 4, kind: input, shape index: {}]   ;;  %s575_s6 = inlined_call_operand.vmem [shape: f32[1,4], index: 6, kind: input, shape index: {}]   ;;  %s576_s7 = inlined_call_operand.vmem [shape: f32[8,4], index: 7, kind: output, shape index: {}]  }
   0x1   :  { %339 = vmatprep.subr.mxu0 %v402_v0  ;;  %v28_v1 = vld [vmem:[%s569_s1 + $0x8] sm:$0x7]  ;;  %v27_v2 = vld [vmem:[%s569_s1] sm:$0xff]  ;;  %343 = vmatprep.mubr.msk.f32.mxu0 %vm403_vm1, %v402_v0  ;;  %v130_v4 = vld [vmem:[%s571_s3 + $0x78] sm:$0xff]  ;;  %vm224_vm3 = vcmask 523264   ;;  %vm298_vm4 = vcmask 31744  }
   0x2   :  { %340 = vmatpush3.msk.msra.mxu0 %vm40_vm0, %v28_v1  ;;  %v26_v3 = vld [vmem:[%s570_s0] sm:$0xff]  ;;  %346 = vmatprep.subr.mxu1 %v402_v0  ;;  %v129_v5 = vld [vmem:[%s571_s3 + $0x70] sm:$0xff]  ;;  %v128_v6 = vld [vmem:[%s571_s3 + $0x68] sm:$0xff] }
   0x3   :  { %341 = vmatprep.subr.mxu0 %v402_v0  ;;  %347 = vmatpush3.msra.mxu1 %v130_v4  ;;  %v127_v7 = vld [vmem:[%s571_s3 + $0x60] sm:$0xff]  ;;  %v126_v8 = vld [vmem:[%s571_s3 + $0x58] sm:$0xff]  ;;  %v125_v9 = vld [vmem:[%s571_s3 + $0x50] sm:$0xff] }
   0x4   :  { %342 = vmatpush3.msra.mxu0 %v27_v2  ;;  %348 = vmatprep.subr.mxu1 %v402_v0  ;;  %v124_v10 = vld [vmem:[%s571_s3 + $0x48] sm:$0xff]  ;;  %v123_v11 = vld [vmem:[%s571_s3 + $0x40] sm:$0xff]  ;;  %v122_v12 = vld [vmem:[%s571_s3 + $0x38] sm:$0xff] }
   0x5   :  { %344 = vmatmul.mubr.msk.f32.vlgmr.msra.gmra.mxu0 %vm36_vm2, %v26_v3  ;;  %349 = vmatpush3.msra.mxu1 %v129_v5  ;;  %v121_v13 = vld [vmem:[%s571_s3 + $0x30] sm:$0xff]  ;;  %v120_v14 = vld [vmem:[%s571_s3 + $0x28] sm:$0xff]  ;;  %v119_v15 = vld [vmem:[%s571_s3 + $0x20] sm:$0xff] }
   0x6   :  { %350 = vmatprep.subr.mxu1 %v402_v0  ;;  %378 = vmatprep.mubr.msk.f32.mxu1 %vm403_vm1, %v402_v0  ;;  %v118_v16 = vld [vmem:[%s571_s3 + $0x18] sm:$0xff]  ;;  %v117_v17 = vld [vmem:[%s571_s3 + $0x10] sm:$0xff]  ;;  %v116_v18 = vld [vmem:[%s571_s3 + $0x8] sm:$0xff] }
   0x7   :  { %351 = vmatpush3.msra.mxu1 %v128_v6  ;;  %381 = vmatprep.subr.mxu0 %v402_v0  ;;  %v115_v19 = vld [vmem:[%s571_s3] sm:$0xff]  ;;  %v216_v20 = vld [vmem:[%s572_s5 + $0x38] sm:$0xff]  ;;  %v215_v21 = vld [vmem:[%s572_s5 + $0x30] sm:$0xff] }
   0x8   :  { %352 = vmatprep.subr.mxu1 %v402_v0  ;;  %397 = vmatprep.mubr.msk.f32.mxu0 %vm403_vm1, %v402_v0  ;;  %v214_v22 = vld [vmem:[%s572_s5 + $0x28] sm:$0xff]  ;;  %v213_v23 = vld [vmem:[%s572_s5 + $0x20] sm:$0xff]  ;;  %v212_v24 = vld [vmem:[%s572_s5 + $0x18] sm:$0xff] }
   0x9   :  { %353 = vmatpush3.msra.mxu1 %v127_v7  ;;  %382 = vmatpush3.msra.mxu0 %v216_v20  ;;  %v304_v25 = vld [vmem:[%s573_s2] ss:$0 sm:$0xff]  ;;  %v211_v30 = vld [vmem:[%s572_s5 + $0x10] sm:$0xff]  ;;  %v210_v31 = vld [vmem:[%s572_s5 + $0x8] sm:$0xff] }
   0xa   :  { %354 = vmatprep.subr.mxu1 %v402_v0  ;;  %383 = vmatprep.subr.mxu0 %v402_v0  ;;  %v209_v32 = vld [vmem:[%s572_s5] sm:$0xff] }
   0xb   :  { %355 = vmatpush3.msra.mxu1 %v126_v8  ;;  %384 = vmatpush3.msra.mxu0 %v215_v21  ;;  %v307_v33 = vld [vmem:[%s574_s4] ss:$0 sm:$0xff] }
   0xc   :  { %356 = vmatprep.subr.mxu1 %v402_v0  ;;  %385 = vmatprep.subr.mxu0 %v402_v0  ;;  %v308_v38 = vld [vmem:[%s575_s6] ss:$0 sm:$0xff] }
   0xd   :  { %357 = vmatpush3.msra.mxu1 %v125_v9  ;;  %386 = vmatpush3.msra.mxu0 %v214_v22 }
   0xe   :  { %358 = vmatprep.subr.mxu1 %v402_v0  ;;  %387 = vmatprep.subr.mxu0 %v402_v0 }
   0xf   :  { %359 = vmatpush3.msra.mxu1 %v124_v10  ;;  %388 = vmatpush3.msra.mxu0 %v213_v23 }
  0x10   :  { %360 = vmatprep.subr.mxu1 %v402_v0  ;;  %389 = vmatprep.subr.mxu0 %v402_v0 }
  0x11   :  { %361 = vmatpush3.msra.mxu1 %v123_v11  ;;  %390 = vmatpush3.msra.mxu0 %v212_v24 }
  0x12   :  { %362 = vmatprep.subr.mxu1 %v402_v0  ;;  %391 = vmatprep.subr.mxu0 %v402_v0 }
  0x13   :  { %363 = vmatpush3.msra.mxu1 %v122_v12  ;;  %392 = vmatpush3.msra.mxu0 %v211_v30 }
  0x14   :  { %364 = vmatprep.subr.mxu1 %v402_v0  ;;  %393 = vmatprep.subr.mxu0 %v402_v0 }
  0x15   :  { %365 = vmatpush3.msra.mxu1 %v121_v13  ;;  %394 = vmatpush3.msra.mxu0 %v210_v31 }
  0x16   :  { %366 = vmatprep.subr.mxu1 %v402_v0  ;;  %395 = vmatprep.subr.mxu0 %v402_v0 }
  0x17   :  { %367 = vmatpush3.msra.mxu1 %v120_v14  ;;  %396 = vmatpush3.msra.mxu0 %v209_v32 }
  0x18   :  { %368 = vmatprep.subr.mxu1 %v402_v0 }
  0x19   :  { %369 = vmatpush3.msra.mxu1 %v119_v15 }
  0x1a   :  { %370 = vmatprep.subr.mxu1 %v402_v0 }
  0x1b   :  { %371 = vmatpush3.msra.mxu1 %v118_v16 }
  0x1c   :  { %372 = vmatprep.subr.mxu1 %v402_v0 }
  0x1d   :  { %373 = vmatpush3.msra.mxu1 %v117_v17 }
  0x1e   :  { %374 = vmatprep.subr.mxu1 %v402_v0 }
  0x1f   :  { %375 = vmatpush3.msra.mxu1 %v116_v18 }
  0x20   :  { %376 = vmatprep.subr.mxu1 %v402_v0 }
  0x21   :  { %377 = vmatpush3.msra.mxu1 %v115_v19 }
  0xc5   :  { %v110_v26 = vpop.f32.mrf.mxu0 }
  0xc6   :  { %v111_v27 = vadd.f32 %v304_v25, %v110_v26 }
  0xc7   :  { %v345_v28 = vpop.f32.mrf.mxu0 }
  0xc8   :  { %v114_v29 = vmax.f32 %v111_v27, 0.0 }
  0xca   :  { %379 = vmatmul.mubr.f32.vlgmr.msra.gmra.mxu1 %v114_v29 }
 0x18a   :  { %v204_v34 = vpop.f32.mrf.mxu1 }
 0x18b   :  { %v205_v35 = vadd.f32 %v307_v33, %v204_v34 }
 0x18c   :  { %v380_v36 = vpop.f32.mrf.mxu1 }
 0x18d   :  { %v208_v37 = vmax.f32 %v205_v35, 0.0 }
 0x18f   :  { %398 = vmatmul.mubr.msk.f32.vlgmr.msra.gmra.mxu0 %vm224_vm3, %v208_v37 }
 0x24f   :  { %v294_v39 = vpop.f32.mrf.mxu0 }
 0x250   :  { %v295_v40 = vadd.f32 %v308_v38, %v294_v39 }
 0x251   :  { %v399_v41 = vpop.f32.mrf.mxu0 }
 0x252   :  { %299 = vst.msk [vmem:[%s576_s7] sm:$0xff] %vm298_vm4, %v295_v40 }

</bundles_post_ra>
